<compile_context>
chip_gen: v6e
topology: v6e:2x2x1
jax: 0.10.0
libtpu: 0.0.40
codegen_flags: <defaults>
</compile_context>

<pallas_src>
import functools

import jax
import jax.numpy as jnp
from jax.experimental import pallas as pl
from jax.experimental.pallas import tpu as pltpu

LANE = 128


def _round_up(x, m):
    return ((x + m - 1) // m) * m


def _pick_spatial_tile(hw_pad, max_tile):
    """Largest multiple of 128 that divides hw_pad and is <= max_tile."""
    n_chunks = hw_pad // LANE
    cap = max(1, min(n_chunks, max_tile // LANE))
    for d in range(cap, 0, -1):
        if n_chunks % d == 0:
            return d * LANE
    return LANE


def _pick_batch_block(b, max_bb):
    """Largest divisor of b that is <= max_bb."""
    cap = max(1, min(b, max_bb))
    for d in range(cap, 0, -1):
        if b % d == 0:
            return d
    return 1


# ----------------------------------------------------------------------------
# Pallas kernel: pointwise (1x1) conv on NCHW == w.T @ x[n] + b, then ReLU
# ----------------------------------------------------------------------------
def _pointwise_conv_kernel(x_ref, wt_ref, b_ref, o_ref, *, compute_dtype):
    # x_ref : (Bb, Cin, TS)   input dtype (f32) -- cast to bf16 in-kernel,
    #                         saving a separate wrapper-side HBM cast pass
    # wt_ref: (Cout, Cin)     bf16 (resident, tiny)
    # b_ref : (Cout, 1)       f32  (column bias, broadcast over lanes)
    # o_ref : (Bb, Cout, TS)  out dtype
    w = wt_ref[...]
    bias = b_ref[...]
    for i in range(x_ref.shape[0]):  # small static unroll over images in the block
        acc = jnp.dot(w, x_ref[i].astype(compute_dtype),
                      preferred_element_type=jnp.float32)       # MXU, f32 acc
        o_ref[i] = jnp.maximum(acc + bias, 0.0).astype(o_ref.dtype)  # f32 epilogue


def pointwise_conv_relu_nchw(x, wt, b_col, *, out_dtype=None,
                             compute_dtype=jnp.bfloat16,
                             step_bytes_target=8 << 20,
                             max_batch_block=8):
    """1x1 conv + bias + ReLU on native NCHW layout.

    x:     [B, Cin, H, W]
    wt:    [Cout, Cin]   (transposed conv weight)
    b_col: [Cout, 1]
    returns [B, Cout, H, W] in out_dtype (default: x.dtype; pass bfloat16 to
    halve the dominant output HBM stream when downstream tolerates it).
    """
    B, Cin, H, W = x.shape
    Cout = wt.shape[0]
    HW = H * W
    out_dtype = x.dtype if out_dtype is None else jnp.dtype(out_dtype)
    in_itemsize = jnp.dtype(x.dtype).itemsize
    out_itemsize = jnp.dtype(out_dtype).itemsize

    # Spatial axis sits on lanes; pad only to the next multiple of 128.
    hw_pad = _round_up(HW, LANE)

    # --- Tile selection: amortize per-step overhead, respect VMEM budget ----
    col_bytes = Cin * in_itemsize + Cout * out_itemsize      # streamed bytes / lane col
    max_tile = max(LANE, (step_bytes_target // col_bytes) // LANE * LANE)
    tile_s = _pick_spatial_tile(hw_pad, max_tile)             # divides hw_pad exactly
    if tile_s == hw_pad:
        # One tile spans the whole spatial axis: block several batch images
        # per grid step so each step still moves a meaningful amount of data.
        max_bb = max(1, step_bytes_target // (tile_s * col_bytes))
        bb = _pick_batch_block(B, min(max_bb, max_batch_block))
    else:
        bb = 1

    # --- Wrapper-side prep: pure reshape (no transpose, no cast) ------------
    x_flat = x.reshape(B, Cin, HW)
    if hw_pad != HW:
        x_flat = jnp.pad(x_flat, ((0, 0), (0, 0), (0, hw_pad - HW)))
    wt = wt.astype(compute_dtype)           # tiny, resident
    b_col = b_col.astype(jnp.float32)

    grid = (B // bb, hw_pad // tile_s)

    # Explicit VMEM budget (double-buffered streamed tiles + slack), safe on
    # v7x's 64 MiB VMEM as well as v5e/v6e's 128 MiB.
    in_tile_bytes = bb * Cin * tile_s * in_itemsize
    out_tile_bytes = bb * Cout * tile_s * out_itemsize
    vmem_need = 2 * (in_tile_bytes + out_tile_bytes) + (2 << 20)
    vmem_limit = int(min(max(vmem_need, 16 << 20), 48 << 20))

    cost = pl.CostEstimate(
        flops=2 * B * HW * Cin * Cout,
        transcendentals=0,
        bytes_accessed=int(x_flat.size * in_itemsize
                           + wt.size * jnp.dtype(compute_dtype).itemsize
                           + b_col.size * 4
                           + B * Cout * hw_pad * out_itemsize),
    )

    kernel = functools.partial(_pointwise_conv_kernel, compute_dtype=compute_dtype)

    y = pl.pallas_call(
        kernel,
        out_shape=jax.ShapeDtypeStruct((B, Cout, hw_pad), out_dtype),
        grid_spec=pltpu.PrefetchScalarGridSpec(
            num_scalar_prefetch=0,
            grid=grid,
            in_specs=[
                pl.BlockSpec((bb, Cin, tile_s), lambda bi, si: (bi, 0, si)),
                pl.BlockSpec((Cout, Cin), lambda bi, si: (0, 0)),
                pl.BlockSpec((Cout, 1), lambda bi, si: (0, 0)),
            ],
            out_specs=pl.BlockSpec((bb, Cout, tile_s), lambda bi, si: (bi, 0, si)),
        ),
        compiler_params=pltpu.CompilerParams(
            dimension_semantics=("parallel", "parallel"),
            vmem_limit_bytes=vmem_limit,
        ),
        cost_estimate=cost,
    )(x_flat, wt, b_col)

    if hw_pad != HW:
        # Only reached when H*W is not a multiple of 128 (<=127 dead columns).
        # TODO(synk): use a masked / BoundedSlice final tile to drop this pass.
        y = y[:, :, :HW]
    return y.reshape(B, Cout, H, W)


# ----------------------------------------------------------------------------
# Synthetic InferenceModule (the wrapped model)
# ----------------------------------------------------------------------------
class SyntheticModel:
    """Pointwise conv model: NCHW -> NCHW with Cout channels."""

    def __init__(self, c_in, c_out, key):
        k_w, k_b = jax.random.split(key)
        # deterministic init (no checkpoint load)
        self.w = jax.random.normal(k_w, (c_in, c_out), jnp.float32) * 0.1
        self.b = jax.random.normal(k_b, (c_out,), jnp.float32) * 0.1
        # kernel-side layouts: transposed weight [Cout, Cin], column bias [Cout, 1]
        self.wt = self.w.T
        self.b_col = self.b.reshape(c_out, 1)
        self.c_in = c_in
        self.c_out = c_out

    # --- InferenceModule protocol -------------------------------------------
    def preprocess(self, x_nchw):
        # Kernel consumes native NCHW -> no layout change / cast (all folded
        # into the Pallas kernel).
        assert x_nchw.shape[1] == self.c_in
        return (x_nchw,), {}

    def forward(self, x_nchw):
        # out_dtype left at default (x.dtype == f32) to preserve the original
        # module's forward semantics; pass out_dtype=jnp.bfloat16 to halve the
        # output HBM stream when downstream tolerates it.
        return pointwise_conv_relu_nchw(x_nchw, self.wt, self.b_col)

    def postprocess(self, y_nchw):
        # Kernel already produces NCHW -> identity.
        return y_nchw

    # distributed hooks: single-device no-ops
    def dp_scatter(self, stage_input):
        return stage_input

    def dp_gather(self, stage_input):
        return stage_input


# ----------------------------------------------------------------------------
# InferenceEngine: scheduler wrapper (mirrors the PyTorch module's _exec_* path)
# ----------------------------------------------------------------------------
class StageInput:
    def __init__(self, args=(), kwargs=None):
        self.Args = tuple(args)
        self.Kwargs = dict(kwargs or {})


class InferenceEngine:
    def __init__(self, model):
        self.model = model
        self._stage_input = StageInput()
        self._inference_output = None
        # single-device, non-parallel schedule
        self.sche_list = [
            "broadcast_inputs",
            "preprocess",
            "call",
            "postprocess",
        ]

    def _exec_broadcast_inputs(self):
        # single device: identity broadcast
        pass

    def _exec_preprocess(self):
        args, kwargs = self.model.preprocess(
            *self._stage_input.Args, **self._stage_input.Kwargs
        )
        self._stage_input = StageInput(args, kwargs)

    def _exec_forward(self):
        outputs = self.model.forward(
            *self._stage_input.Args, **self._stage_input.Kwargs
        )
        if not isinstance(outputs, tuple):
            outputs = (outputs,)
        self._stage_input = StageInput(outputs, {})

    def _exec_postprocess(self):
        self._inference_output = self.model.postprocess(
            *self._stage_input.Args, **self._stage_input.Kwargs
        )

    _INSTRUCTION_MAP = {
        "broadcast_inputs": _exec_broadcast_inputs,
        "preprocess": _exec_preprocess,
        "call": _exec_forward,
        "postprocess": _exec_postprocess,
    }

    def _exec_sche(self, sche_list):
        for step in sche_list:
            if step not in self._INSTRUCTION_MAP:
                raise NotImplementedError(f"{step!r} not supported.")
            self._INSTRUCTION_MAP[step](self)

    def forward(self, *args, **kwargs):
        self._stage_input = StageInput(args, kwargs)
        self._inference_output = None
        self._exec_sche(self.sche_list)
        return self._inference_output

    __call__ = forward


# TODO(synk): checkpoint loading / OffloadModule / Kernel-vs-Torch runtime
# selection and multi-device broadcast/dp_scatter/dp_gather have no
# single-device Pallas equivalent; they are modeled as identity no-ops here.


if __name__ == "__main__":
    key = jax.random.PRNGKey(0)
    k_model, k_x = jax.random.split(key)

    B, C_IN, H, W = 2, 4, 16, 16   # NCHW input, H*W = 256 lanes per image
    C_OUT = 32

    model = SyntheticModel(C_IN, C_OUT, k_model)
    engine = InferenceEngine(model)

    x = jax.random.normal(k_x, (B, C_IN, H, W), jnp.float32)

    y = engine(x)
    y = jax.block_until_ready(y)

    # reference: 1x1 conv + bias + relu in plain JAX (NCHW semantics, f32)
    y_ref = jnp.einsum("nchw,co->nohw", x, model.w) + model.b[None, :, None, None]
    y_ref = jnp.maximum(y_ref, 0.0)

    assert y.shape == (B, C_OUT, H, W), y.shape
    # bf16-streamed operands with f32 accumulation -> loosened tolerance.
    assert jnp.allclose(y, y_ref, atol=2e-2, rtol=2e-2), "mismatch vs reference"

    print("KERNEL_OK")
</pallas_src>

<mosaic_0001>
module attributes {stable_mosaic.version = 11 : i64} {
  func.func @_pointwise_conv_kernel(%arg0: i32, %arg1: i32, %arg2: memref<2x4x256xf32, #tpu.memory_space<vmem>>, %arg3: memref<32x4xbf16, #tpu.memory_space<vmem>>, %arg4: memref<32x1xf32, #tpu.memory_space<vmem>>, %arg5: memref<2x32x256xf32, #tpu.memory_space<vmem>>) attributes {dimension_semantics = [#tpu.dimension_semantics<parallel>, #tpu.dimension_semantics<parallel>], iteration_bounds = array<i64: 1, 1>, scalar_prefetch = 0 : i64, scratch_operands = 0 : i64, tpu.core_type = #tpu.core_type<tc>, window_params = [{transform_indices = @transform_0, window_bounds = array<i64: 2, 4, 256>}, {pipeline_mode = #tpu.pipeline_mode<synchronous>, transform_indices = @transform_1, window_bounds = array<i64: 32, 4>}, {pipeline_mode = #tpu.pipeline_mode<synchronous>, transform_indices = @transform_2, window_bounds = array<i64: 32, 1>}, {transform_indices = @transform_3, window_bounds = array<i64: 2, 32, 256>}]} {
    %c0 = arith.constant 0 : index
    %c0_0 = arith.constant 0 : index
    %0 = vector.load %arg3[%c0, %c0_0] : memref<32x4xbf16, #tpu.memory_space<vmem>>, vector<32x4xbf16>
    %c0_1 = arith.constant 0 : index
    %c0_2 = arith.constant 0 : index
    %1 = vector.load %arg4[%c0_1, %c0_2] : memref<32x1xf32, #tpu.memory_space<vmem>>, vector<32x1xf32>
    %c0_3 = arith.constant 0 : index
    %c0_4 = arith.constant 0 : index
    %c0_5 = arith.constant 0 : index
    %2 = vector.load %arg2[%c0_3, %c0_4, %c0_5] : memref<2x4x256xf32, #tpu.memory_space<vmem>>, vector<1x4x256xf32>
    %3 = vector.shape_cast %2 : vector<1x4x256xf32> to vector<4x256xf32>
    %4 = arith.truncf %3 : vector<4x256xf32> to vector<4x256xbf16>
    %cst = arith.constant dense<0.000000e+00> : vector<32x256xf32>
    %5 = tpu.matmul %0, %4, %cst {dimension_numbers = #tpu.dot_dimension_numbers<[1], [0], [0], [1], [0, 0, 1, 1], [], []>} : vector<32x4xbf16>, vector<4x256xbf16>, vector<32x256xf32> -> vector<32x256xf32>
    %6 = vector.broadcast %1 : vector<32x1xf32> to vector<32x256xf32>
    %7 = arith.addf %5, %6 : vector<32x256xf32>
    %cst_6 = arith.constant 0.000000e+00 : f32
    %8 = vector.broadcast %cst_6 : f32 to vector<32x256xf32>
    %9 = arith.maximumf %7, %8 : vector<32x256xf32>
    %c0_7 = arith.constant 0 : index
    %c0_8 = arith.constant 0 : index
    %c0_9 = arith.constant 0 : index
    %10 = vector.load %arg5[%c0_7, %c0_8, %c0_9] : memref<2x32x256xf32, #tpu.memory_space<vmem>>, vector<1x32x256xf32>
    %11 = vector.shape_cast %10 : vector<1x32x256xf32> to vector<32x256xf32>
    %12 = vector.shape_cast %9 : vector<32x256xf32> to vector<1x32x256xf32>
    tpu.vector_store %arg5[%c0_7, %c0_8, %c0_9], %12 {strides = array<i32>} : memref<2x32x256xf32, #tpu.memory_space<vmem>>, vector<1x32x256xf32>,
    %c1 = arith.constant 1 : index
    %c0_10 = arith.constant 0 : index
    %c0_11 = arith.constant 0 : index
    %13 = vector.load %arg2[%c1, %c0_10, %c0_11] : memref<2x4x256xf32, #tpu.memory_space<vmem>>, vector<1x4x256xf32>
    %14 = vector.shape_cast %13 : vector<1x4x256xf32> to vector<4x256xf32>
    %15 = arith.truncf %14 : vector<4x256xf32> to vector<4x256xbf16>
    %cst_12 = arith.constant dense<0.000000e+00> : vector<32x256xf32>
    %16 = tpu.matmul %0, %15, %cst_12 {dimension_numbers = #tpu.dot_dimension_numbers<[1], [0], [0], [1], [0, 0, 1, 1], [], []>} : vector<32x4xbf16>, vector<4x256xbf16>, vector<32x256xf32> -> vector<32x256xf32>
    %17 = vector.broadcast %1 : vector<32x1xf32> to vector<32x256xf32>
    %18 = arith.addf %16, %17 : vector<32x256xf32>
    %cst_13 = arith.constant 0.000000e+00 : f32
    %19 = vector.broadcast %cst_13 : f32 to vector<32x256xf32>
    %20 = arith.maximumf %18, %19 : vector<32x256xf32>
    %c1_14 = arith.constant 1 : index
    %c0_15 = arith.constant 0 : index
    %c0_16 = arith.constant 0 : index
    %21 = vector.load %arg5[%c1_14, %c0_15, %c0_16] : memref<2x32x256xf32, #tpu.memory_space<vmem>>, vector<1x32x256xf32>
    %22 = vector.shape_cast %21 : vector<1x32x256xf32> to vector<32x256xf32>
    %23 = vector.shape_cast %20 : vector<32x256xf32> to vector<1x32x256xf32>
    tpu.vector_store %arg5[%c1_14, %c0_15, %c0_16], %23 {strides = array<i32>} : memref<2x32x256xf32, #tpu.memory_space<vmem>>, vector<1x32x256xf32>,
    return
  }
  func.func @transform_0(%arg0: i32, %arg1: i32) -> (i32, i32, i32) {
    %c0_i32 = arith.constant 0 : i32
    %c0_i32_0 = arith.constant 0 : i32
    return %arg0, %c0_i32, %arg1 : i32, i32, i32
  }
  func.func @transform_1(%arg0: i32, %arg1: i32) -> (i32, i32) {
    %c0_i32 = arith.constant 0 : i32
    %c0_i32_0 = arith.constant 0 : i32
    %c0_i32_1 = arith.constant 0 : i32
    return %c0_i32, %c0_i32_0 : i32, i32
  }
  func.func @transform_2(%arg0: i32, %arg1: i32) -> (i32, i32) {
    %c0_i32 = arith.constant 0 : i32
    %c0_i32_0 = arith.constant 0 : i32
    %c0_i32_1 = arith.constant 0 : i32
    return %c0_i32, %c0_i32_0 : i32, i32
  }
  func.func @transform_3(%arg0: i32, %arg1: i32) -> (i32, i32, i32) {
    %c0_i32 = arith.constant 0 : i32
    %c0_i32_0 = arith.constant 0 : i32
    return %arg0, %c0_i32, %arg1 : i32, i32, i32
  }
}

</mosaic_0001>

<bundles_post_ra>
// kernel: tpu_custom_call.1
= control target key start
LH: loop header
LB: loop body
LE: loop exit
PB: predicated region body
PF: predicated region fallthrough
CT: control target
= control target key end

     0   :  { %vm67_vm0 = vcmask 1041408   ;;  %v283_v6 = vmov 0   ;;  %s338_s0 = inlined_call_operand.vmem [shape: f32[2,4,256], index: 0, kind: input, shape index: {}]   ;;  %s339_s1 = inlined_call_operand.vmem [shape: bf16[32,4], index: 1, kind: input, shape index: {}]   ;;  %s340_s2 = inlined_call_operand.vmem [shape: f32[32,1], index: 2, kind: input, shape index: {}]   ;;  %s341_s3 = inlined_call_operand.hbm [shape: f32[2,32,256], index: 3, kind: output, shape index: {}]  }
   0x1   :  { %v24_v0 = vld [vmem:[%s338_s0] sm:$0xff]  ;;  %v247_v1 = vld [vmem:[%s338_s0 + $0x8] sm:$0xff]  ;;  %106 = vmatprep.mubr.bf16.mxu0 %v283_v6  ;;  %188 = vmatprep.mubr.bf16.mxu1 %v283_v6  ;;  %v22_v12 = vld [vmem:[%s340_s2 + $0x10] sm:$0xff] }
   0x2   :  { %v26_v2 = vcombine.high %v24_v0, %v24_v0  ;;  %v146_v3 = vcombine.high %v247_v1, %v247_v1  ;;  %v28_v4 = vpack.c.bf16 %v24_v0, %v24_v0  ;;  %v148_v5 = vpack.c.bf16 %v247_v1, %v247_v1  ;;  %255 = vset.pattern.permute.xlu0 %v283_v6  ;;  %v20_v7 = vld [vmem:[%s340_s2] sm:$0xff]  ;;  %v21_v13 = vld [vmem:[%s340_s2 + $0x8] sm:$0xff] }
   0x3   :  { %32 = vperm.xlu0 %255, %v20_v7   ;;  %256 = vset.pattern.permute.xlu1 %v283_v6 }
   0x4   :  { %v29_v8 = vpack.c.bf16 %v26_v2, %v26_v2  ;;  %v149_v9 = vpack.c.bf16 %v146_v3, %v146_v3  ;;  %v69_v10 = vsel %vm67_vm0, %v28_v4, 0  ;;  %v151_v11 = vsel %vm67_vm0, %v148_v5, 0  ;;  %42 = vperm.xlu1 %256, %v22_v12  }
   0x5   :  { %8 = vsyncpa [#allocation3], 0  ;;  %v259_v14 = vld [vmem:[%s339_s1] sm:$0xff]   ;;  %v23_v15 = vld [vmem:[%s340_s2 + $0x18] sm:$0xff]  ;;  %vm60_vm1 = vcmask 31744  }
   0x6   :  { %244 = vmatprep.subr.msk.bf16.mxu0 %vm67_vm0, %v29_v8  ;;  %248 = vmatprep.subr.msk.bf16.mxu1 %vm67_vm0, %v149_v9  ;;  %v260_v16 = vld [vmem:[%s339_s1 + $0x8] sm:$0xff]   ;;  %s284_s1 = smov [#allocation2]  }
   0x7   :  { %89 = vmatpush1.bf16.msra.mxu0 %v69_v10  ;;  %171 = vmatpush1.bf16.msra.mxu1 %v151_v11  ;;  %s231_s2 = sshll.u32 %s284_s1, 4  ;;  %s232_s2 = int_to_ptr.vmem [resolvable:$true] %s231_s2 }
   0x8   :  { %37 = vperm.xlu0 %255, %v21_v13   ;;  %47 = vperm.xlu1 %256, %v23_v15   ;;  %s261_s27 = scalar_lea.vmem %s232_s2, 2048  ;;  %p266_p1 = scmp.lt.s32.totalorder %s232_s2, %s232_s2 }
   0x9   :  { %p262_p0 = scmp.ne.s32.totalorder %s232_s2, %s261_s27  ;;  %p267_p2 = scmp.lt.s32.totalorder %s261_s27, %s261_s27 }
   0xa   :  { %245 = vmatmul.mubr.msk.bf16.vlgmr.msra.gmra.mxu0 %vm60_vm1, %v259_v14  ;;  %249 = vmatmul.mubr.msk.bf16.vlgmr.msra.gmra.mxu1 %vm60_vm1, %v259_v14 }
   0xb   :  { %116 = vmatprep.mubr.bf16.mxu0 %v283_v6  ;;  %198 = vmatprep.mubr.bf16.mxu1 %v283_v6  ;;  %p268_p3 = por %p267_p2, %p266_p1 }
   0xd   :  { %p269_p4 = pnand %p268_p3, %p262_p0 }
  0x12   :  { %246 = vmatmul.mubr.msk.bf16.gmra.mxu0 %vm60_vm1, %v260_v16  ;;  %250 = vmatmul.mubr.msk.bf16.gmra.mxu1 %vm60_vm1, %v260_v16 }
  0x7e   :  { %v33_v17 = vpop.permute.xlu0 %32 }
  0x7f   :  { %v43_v35 = vpop.permute.xlu1 %42 }
  0x83   :  { %v38_v22 = vpop.permute.xlu0 %37  ;;  %v48_v52 = vpop.permute.xlu1 %47 }
  0xca   :  { %v108_v18 = vpop.f32.mrf.mxu0  ;;  %v190_v19 = vpop.f32.mrf.mxu1 }
  0xcb   :  { %v109_v20 = vadd.f32 %v108_v18, %v33_v17  ;;  %v191_v21 = vadd.f32 %v190_v19, %v33_v17 }
  0xcc   :  { %v110_v23 = vpop.f32.mrf.mxu0  ;;  %v192_v24 = vpop.f32.mrf.mxu1 }
  0xcd   :  { %v127_v25 = vmax.f32 %v109_v20, 0.0  ;;  %v209_v26 = vmax.f32 %v191_v21, 0.0  ;;  %v111_v27 = vadd.f32 %v110_v23, %v33_v17  ;;  %v193_v28 = vadd.f32 %v192_v24, %v33_v17 }
  0xce   :  { %v112_v29 = vpop.f32.mrf.mxu0  ;;  %v194_v30 = vpop.f32.mrf.mxu1 }
  0xcf   :  { %135 = vst [vmem:[#allocation2] sm:$0xff] %v127_v25  ;;  %218 = vst [vmem:[#allocation2 + $0x40] sm:$0xff] %v209_v26  ;;  %v128_v31 = vmax.f32 %v111_v27, 0.0  ;;  %v210_v32 = vmax.f32 %v193_v28, 0.0  ;;  %v113_v33 = vadd.f32 %v112_v29, %v38_v22  ;;  %v195_v34 = vadd.f32 %v194_v30, %v38_v22 }
  0xd0   :  { %v114_v36 = vpop.f32.mrf.mxu0  ;;  %v196_v37 = vpop.f32.mrf.mxu1 }
  0xd1   :  { %136 = vst [vmem:[#allocation2 + $0x8] sm:$0xff] %v128_v31  ;;  %219 = vst [vmem:[#allocation2 + $0x48] sm:$0xff] %v210_v32  ;;  %v129_v38 = vmax.f32 %v113_v33, 0.0  ;;  %v211_v39 = vmax.f32 %v195_v34, 0.0  ;;  %v115_v40 = vadd.f32 %v114_v36, %v38_v22  ;;  %v197_v41 = vadd.f32 %v196_v37, %v38_v22 }
  0xd2   :  { %v118_v42 = vpop.f32.mrf.mxu0  ;;  %v200_v43 = vpop.f32.mrf.mxu1 }
  0xd3   :  { %137 = vst [vmem:[#allocation2 + $0x10] sm:$0xff] %v129_v38  ;;  %220 = vst [vmem:[#allocation2 + $0x50] sm:$0xff] %v211_v39  ;;  %v130_v44 = vmax.f32 %v115_v40, 0.0  ;;  %v212_v45 = vmax.f32 %v197_v41, 0.0  ;;  %v119_v46 = vadd.f32 %v118_v42, %v43_v35  ;;  %v201_v47 = vadd.f32 %v200_v43, %v43_v35 }
  0xd4   :  { %v120_v48 = vpop.f32.mrf.mxu0  ;;  %v202_v49 = vpop.f32.mrf.mxu1 }
  0xd5   :  { %138 = vst [vmem:[#allocation2 + $0x18] sm:$0xff] %v130_v44  ;;  %221 = vst [vmem:[#allocation2 + $0x58] sm:$0xff] %v212_v45  ;;  %v131_v50 = vmax.f32 %v119_v46, 0.0  ;;  %v213_v51 = vmax.f32 %v201_v47, 0.0  ;;  %v121_v53 = vadd.f32 %v120_v48, %v43_v35  ;;  %v203_v54 = vadd.f32 %v202_v49, %v43_v35 }
  0xd6   :  { %v122_v55 = vpop.f32.mrf.mxu0  ;;  %v204_v56 = vpop.f32.mrf.mxu1 }
  0xd7   :  { %139 = vst [vmem:[#allocation2 + $0x20] sm:$0xff] %v131_v50  ;;  %222 = vst [vmem:[#allocation2 + $0x60] sm:$0xff] %v213_v51  ;;  %v132_v57 = vmax.f32 %v121_v53, 0.0  ;;  %v214_v58 = vmax.f32 %v203_v54, 0.0  ;;  %v123_v59 = vadd.f32 %v122_v55, %v48_v52  ;;  %v205_v60 = vadd.f32 %v204_v56, %v48_v52 }
  0xd8   :  { %v124_v61 = vpop.f32.mrf.mxu0  ;;  %v206_v62 = vpop.f32.mrf.mxu1 }
  0xd9   :  { %140 = vst [vmem:[#allocation2 + $0x28] sm:$0xff] %v132_v57  ;;  %223 = vst [vmem:[#allocation2 + $0x68] sm:$0xff] %v214_v58  ;;  %v133_v63 = vmax.f32 %v123_v59, 0.0  ;;  %v215_v0 = vmax.f32 %v205_v60, 0.0  ;;  %v125_v1 = vadd.f32 %v124_v61, %v48_v52  ;;  %v207_v2 = vadd.f32 %v206_v62, %v48_v52 }
  0xdb   :  { %141 = vst [vmem:[#allocation2 + $0x30] sm:$0xff] %v133_v63  ;;  %224 = vst [vmem:[#allocation2 + $0x70] sm:$0xff] %v215_v0  ;;  %v134_v3 = vmax.f32 %v125_v1, 0.0  ;;  %v216_v4 = vmax.f32 %v207_v2, 0.0 }
  0xdd   :  { %142 = vst [vmem:[#allocation2 + $0x38] sm:$0xff] %v134_v3  ;;  %225 = vst [vmem:[#allocation2 + $0x78] sm:$0xff] %v216_v4 }
  0xde   :  { %272 = shalt.err (!%p269_p4)
}
  0xdf   :  { %s285_s28 = smov 256   ;;  %s286_s29 = smov 16  }
  0xe0   :  { %237 = dma.vmem_to_hbm [thread:$0]  %s232_s2, 2048, %s341_s3, [#allocation3], %s285_s28, %s285_s28, %s286_s29  }
  0xe1   :  { %281 = dma.done.wait [#allocation3], 2048  }
  0xe2   :  { %282 = vsyncadd [#allocation3], 4294965248 }
  0xe3   :  { %241 = vsyncpa [#allocation3], 1 }

</bundles_post_ra>
